<compile_context>
chip_gen: v6e
topology: v6e:2x2x1
jax: 0.10.0
libtpu: 0.0.40
codegen_flags: <defaults>
</compile_context>

<pallas_src>
import functools

import jax
import jax.numpy as jnp
from jax.experimental import pallas as pl
from jax.experimental.pallas import tpu as pltpu


# ----------------------------- helpers -----------------------------

def _round_up(x, m):
    return ((x + m - 1) // m) * m


def _default_vmem_limit():
    try:
        cap = pltpu.get_tpu_info().vmem_capacity_bytes
    except Exception:
        cap = 64 * 1024 * 1024
    # ~3/4 of physical VMEM, capped at 100 MiB (=> ~48 MiB on v7x, ~96 MiB on v5e/v6e).
    return int(min(cap * 3 // 4, 100 * 1024 * 1024))


_VMEM_LIMIT = _default_vmem_limit()


# ----------------------------- Pallas kernel -----------------------------

def _norm_linear_matmul_kernel(*refs, has_scale, single_k):
    """Fused matmul: out = (x @ w) [* col_scale].

    refs layout:
      has_scale=False: (x_ref, w_ref, o_ref[, acc_ref])
      has_scale=True : (x_ref, w_ref, s_ref, o_ref[, acc_ref])
    acc_ref is present only when K is tiled (single_k=False).
    """
    if has_scale:
        x_ref, w_ref, s_ref, o_ref = refs[0], refs[1], refs[2], refs[3]
        acc_ref = None if single_k else refs[4]
    else:
        x_ref, w_ref, o_ref = refs[0], refs[1], refs[2]
        s_ref = None
        acc_ref = None if single_k else refs[3]

    part = jnp.dot(x_ref[...].astype(jnp.bfloat16),
                   w_ref[...].astype(jnp.bfloat16),
                   preferred_element_type=jnp.float32)

    if single_k:
        y = part * s_ref[...] if has_scale else part
        o_ref[...] = y.astype(o_ref.dtype)
    else:
        @pl.when(pl.program_id(2) == 0)
        def _():
            acc_ref[...] = jnp.zeros_like(acc_ref)

        acc_ref[...] += part

        @pl.when(pl.program_id(2) == pl.num_programs(2) - 1)
        def _():
            y = acc_ref[...] * s_ref[...] if has_scale else acc_ref[...]
            o_ref[...] = y.astype(o_ref.dtype)


def _fused_matmul(x2d, w2d, col_scale=None, out_dtype=jnp.float32,
                  tm=512, tn=256, tk=512):
    """out = (x2d @ w2d) * col_scale, no padded copies of x; w2d N must be a 128 multiple.

    Grid = (N, M[, K]); N leading "parallel", K innermost "arbitrary". K tile either divides
    K exactly or equals K (full), so partial-K garbage can never contaminate valid outputs.
    """
    M, K = x2d.shape
    K2, N_pad = w2d.shape
    assert K == K2
    assert N_pad % 128 == 0, "weight N must be padded to a 128 multiple at prepare time"

    tm = min(tm, _round_up(M, 8))          # sublane-dim multiple of 8; partial M block OK
    tn = min(tn, N_pad)                    # lane-dense, 128-multiple tiles
    if K % tk != 0:
        tk = K                             # full-K block (no K-tail, no masking needed)
    n_k = K // tk

    has_scale = col_scale is not None
    single_k = (n_k == 1)

    in_specs = []
    args = [x2d, w2d]
    if single_k:
        grid = (pl.cdiv(N_pad, tn), pl.cdiv(M, tm))
        in_specs.append(pl.BlockSpec((tm, tk), lambda jn, jm: (jm, 0)))
        in_specs.append(pl.BlockSpec((tk, tn), lambda jn, jm: (0, jn)))
        if has_scale:
            in_specs.append(pl.BlockSpec((1, tn), lambda jn, jm: (0, jn)))
            args.append(col_scale)
        out_spec = pl.BlockSpec((tm, tn), lambda jn, jm: (jm, jn))
        scratch = []
        dim_sem = ("parallel", "parallel")
    else:
        grid = (pl.cdiv(N_pad, tn), pl.cdiv(M, tm), n_k)
        in_specs.append(pl.BlockSpec((tm, tk), lambda jn, jm, k: (jm, k)))
        in_specs.append(pl.BlockSpec((tk, tn), lambda jn, jm, k: (k, jn)))
        if has_scale:
            in_specs.append(pl.BlockSpec((1, tn), lambda jn, jm, k: (0, jn)))
            args.append(col_scale)
        out_spec = pl.BlockSpec((tm, tn), lambda jn, jm, k: (jm, jn))
        scratch = [pltpu.VMEM((tm, tn), jnp.float32)]
        dim_sem = ("parallel", "parallel", "arbitrary")

    kernel = functools.partial(_norm_linear_matmul_kernel,
                               has_scale=has_scale, single_k=single_k)
    return pl.pallas_call(
        kernel,
        out_shape=jax.ShapeDtypeStruct((M, N_pad), out_dtype),
        grid=grid,
        in_specs=in_specs,
        out_specs=out_spec,
        scratch_shapes=scratch,
        compiler_params=pltpu.CompilerParams(
            dimension_semantics=dim_sem,
            vmem_limit_bytes=_VMEM_LIMIT),
    )(*args)


# ----------------------------- NormLinear API -----------------------------

def init_norm_linear(key, in_dim, out_dim):
    """xavier_uniform_ with gain = calculate_gain('relu') = sqrt(2)."""
    gain = jnp.sqrt(2.0)
    lim = gain * jnp.sqrt(6.0 / (in_dim + out_dim))
    weight = jax.random.uniform(key, (in_dim, out_dim), jnp.float32, -lim, lim)
    return {'weight': weight}


def prepare_norm_linear(weight):
    """One-time weight preparation (hoisted out of the per-step forward).

    F.normalize(W, dim=0) is applied in f32 (denominator max(||col||, 1e-12)), then the
    weight is cast to bf16 and its N dim padded to a multiple of 128 for lane-dense stores.
    """
    w32 = weight.astype(jnp.float32)
    norm = jnp.sqrt(jnp.sum(w32 * w32, axis=0, keepdims=True))
    w_n = w32 / jnp.maximum(norm, 1e-12)
    n = weight.shape[1]
    n_pad = _round_up(n, 128)
    if n_pad != n:
        w_n = jnp.pad(w_n, ((0, 0), (0, n_pad - n)))
    return {'w_prepared': w_n.astype(jnp.bfloat16), 'out_dim': n}


def norm_linear_apply(x, prepared, out_dtype=jnp.float32):
    """NormLinear forward with a prepared (pre-normalized, bf16, N-padded) weight."""
    k = x.shape[-1]
    x2 = x.reshape(-1, k)
    out = _fused_matmul(x2, prepared['w_prepared'], col_scale=None, out_dtype=out_dtype)
    n = prepared['out_dim']
    out = out[:, :n]
    return out.reshape(x.shape[:-1] + (n,))


def norm_linear(x, weight, out_dtype=jnp.float32):
    """NormLinear forward for an un-prepared (e.g. training-time) weight.

    The column normalization is computed once per call (f32) and fused into the matmul
    epilogue as an output-column scale; the f32 weight is streamed and cast in-kernel.
    """
    k, n = weight.shape
    inv_norm = jax.lax.rsqrt(
        jnp.maximum(jnp.sum(weight.astype(jnp.float32) ** 2, axis=0, keepdims=True),
                    1e-24))  # == 1 / max(||col||, 1e-12)
    n_pad = _round_up(n, 128)
    w = weight if n_pad == n else jnp.pad(weight, ((0, 0), (0, n_pad - n)))
    s = inv_norm if n_pad == n else jnp.pad(inv_norm, ((0, 0), (0, n_pad - n)))
    x2 = x.reshape(-1, k)
    out = _fused_matmul(x2, w, col_scale=s, out_dtype=out_dtype)[:, :n]
    return out.reshape(x.shape[:-1] + (n,))


def _reference(x, weight):
    w_n = weight / jnp.maximum(jnp.linalg.norm(weight, axis=0, keepdims=True), 1e-12)
    return jnp.einsum('...i,io->...o', x, w_n)


# ----------------------------- main -----------------------------

if __name__ == "__main__":
    key = jax.random.PRNGKey(0)
    k1, k2, k3, k4, k5, k6 = jax.random.split(key, 6)

    # Case 1: classifier-style usage (T, B, hidden) -> (T, B, num_classes); tiny shapes.
    T, B, in_dim, out_dim = 8, 2, 32, 20
    x = jax.random.normal(k1, (T, B, in_dim), jnp.float32)
    w = init_norm_linear(k2, in_dim, out_dim)['weight']

    prepared = prepare_norm_linear(w)
    out_prep = norm_linear_apply(x, prepared)       # prepared-weight path (no scale operand)
    out_dyn = norm_linear(x, w)                     # dynamic path (fused col-scale epilogue)
    jax.block_until_ready(out_prep)
    jax.block_until_ready(out_dyn)
    ref = _reference(x, w)
    assert out_prep.shape == (T, B, out_dim)
    assert bool(jnp.allclose(out_prep, ref, atol=8e-2, rtol=8e-2))
    assert bool(jnp.allclose(out_dyn, ref, atol=8e-2, rtol=8e-2))

    # Case 2: partial M block, full-K block (K not a 512 multiple), partial final N tile.
    M2, K2, N2 = 300, 640, 384
    x2 = jax.random.normal(k3, (M2, K2), jnp.float32)
    w2 = 0.05 * jax.random.normal(k4, (K2, N2), jnp.float32)
    o2 = norm_linear_apply(x2, prepare_norm_linear(w2))
    jax.block_until_ready(o2)
    assert bool(jnp.allclose(o2, _reference(x2, w2), atol=1e-1, rtol=1e-1))

    # Case 3: K tiled (multi-K grid with f32 VMEM accumulator + pl.when init/finalize).
    M3, K3, N3 = 64, 1024, 256
    x3 = jax.random.normal(k5, (M3, K3), jnp.float32)
    w3 = 0.03 * jax.random.normal(k6, (K3, N3), jnp.float32)
    o3 = norm_linear_apply(x3, prepare_norm_linear(w3))
    jax.block_until_ready(o3)
    assert bool(jnp.allclose(o3, _reference(x3, w3), atol=1e-1, rtol=1e-1))

    print("KERNEL_OK")
</pallas_src>

<mosaic_0001>
module attributes {stable_mosaic.version = 11 : i64} {
  func.func @_norm_linear_matmul_kernel(%arg0: i32, %arg1: i32, %arg2: memref<16x32xf32, #tpu.memory_space<vmem>>, %arg3: memref<32x128xbf16, #tpu.memory_space<vmem>>, %arg4: memref<16x128xf32, #tpu.memory_space<vmem>>) attributes {dimension_semantics = [#tpu.dimension_semantics<parallel>, #tpu.dimension_semantics<parallel>], iteration_bounds = array<i64: 1, 1>, scalar_prefetch = 0 : i64, scratch_operands = 0 : i64, tpu.core_type = #tpu.core_type<tc>, window_params = [{transform_indices = @transform_0, window_bounds = array<i64: 16, 32>}, {transform_indices = @transform_1, window_bounds = array<i64: 32, 128>}, {transform_indices = @transform_2, window_bounds = array<i64: 16, 128>}]} {
    %c0 = arith.constant 0 : index
    %c0_0 = arith.constant 0 : index
    %0 = vector.load %arg2[%c0, %c0_0] : memref<16x32xf32, #tpu.memory_space<vmem>>, vector<16x32xf32>
    %1 = arith.truncf %0 : vector<16x32xf32> to vector<16x32xbf16>
    %c0_1 = arith.constant 0 : index
    %c0_2 = arith.constant 0 : index
    %2 = vector.load %arg3[%c0_1, %c0_2] : memref<32x128xbf16, #tpu.memory_space<vmem>>, vector<32x128xbf16>
    %cst = arith.constant dense<0.000000e+00> : vector<16x128xf32>
    %3 = tpu.matmul %1, %2, %cst {dimension_numbers = #tpu.dot_dimension_numbers<[1], [0], [0], [1], [0, 0, 1, 1], [], []>} : vector<16x32xbf16>, vector<32x128xbf16>, vector<16x128xf32> -> vector<16x128xf32>
    %c0_3 = arith.constant 0 : index
    %c0_4 = arith.constant 0 : index
    %4 = vector.load %arg4[%c0_3, %c0_4] : memref<16x128xf32, #tpu.memory_space<vmem>>, vector<16x128xf32>
    tpu.vector_store %arg4[%c0_3, %c0_4], %3 {strides = array<i32>} : memref<16x128xf32, #tpu.memory_space<vmem>>, vector<16x128xf32>,
    return
  }
  func.func @transform_0(%arg0: i32, %arg1: i32) -> (i32, i32) {
    %c0_i32 = arith.constant 0 : i32
    %c0_i32_0 = arith.constant 0 : i32
    return %arg1, %c0_i32 : i32, i32
  }
  func.func @transform_1(%arg0: i32, %arg1: i32) -> (i32, i32) {
    %c0_i32 = arith.constant 0 : i32
    %c0_i32_0 = arith.constant 0 : i32
    return %c0_i32, %arg0 : i32, i32
  }
  func.func @transform_2(%arg0: i32, %arg1: i32) -> (i32, i32) {
    %c0_i32 = arith.constant 0 : i32
    return %arg1, %arg0 : i32, i32
  }
}

</mosaic_0001>

<bundles_post_ra>
// kernel: tpu_custom_call.1
= control target key start
LH: loop header
LB: loop body
LE: loop exit
PB: predicated region body
PF: predicated region fallthrough
CT: control target
= control target key end

     0   :  { %7 = vsyncpa [#allocation3], 0  ;;  %s255_s0 = inlined_call_operand.hbm [shape: f32[16,32], index: 0, kind: input, shape index: {}]   ;;  %s256_s1 = inlined_call_operand.hbm [shape: bf16[32,128], index: 1, kind: input, shape index: {}]   ;;  %s257_s2 = inlined_call_operand.hbm [shape: f32[16,128], index: 2, kind: output, shape index: {}]  }
   0x1   :  { %8 = vsyncpa [#allocation6], 0 }
   0x2   :  { %9 = vsyncpa [#allocation4], 0  ;;  %s216_s9 = smov [#allocation2]  }
   0x3   :  { %s15_s10 = sshll.u32 %s216_s9, 4  ;;  %s16_s10 = int_to_ptr.vmem [resolvable:$true] %s15_s10 }
   0x4   :  { %s158_s11 = scalar_lea.vmem %s16_s10, 256  ;;  %p163_p1 = scmp.lt.s32.totalorder %s16_s10, %s16_s10 }
   0x5   :  { %p159_p0 = scmp.ne.s32.totalorder %s16_s10, %s158_s11  ;;  %p164_p2 = scmp.lt.s32.totalorder %s158_s11, %s158_s11 }
   0x7   :  { %p165_p3 = por %p164_p2, %p163_p1 }
   0x9   :  { %p166_p4 = pnand %p165_p3, %p159_p0 }
   0xb   :  { %169 = shalt.err (!%p166_p4)
}
   0xc   :  { %s217_s12 = smov 128   ;;  %s218_s13 = smov 8  }
   0xd   :  { %21 = dma.hbm_to_vmem [thread:$0]  %s255_s0, 256, %s16_s10, [#allocation3], %s217_s12, %s217_s12, %s218_s13  }
   0xe   :  { %s219_s16 = smov [#allocation5]  }
   0xf   :  { %s27_s17 = sshll.u32 %s219_s16, 4  ;;  %s28_s17 = int_to_ptr.vmem [resolvable:$true] %s27_s17 }
  0x10   :  { %s178_s18 = scalar_lea.vmem %s28_s17, 256  ;;  %p183_p6 = scmp.lt.s32.totalorder %s28_s17, %s28_s17 }
  0x11   :  { %p179_p5 = scmp.ne.s32.totalorder %s28_s17, %s178_s18  ;;  %p184_p7 = scmp.lt.s32.totalorder %s178_s18, %s178_s18 }
  0x13   :  { %p185_p8 = por %p184_p7, %p183_p6 }
  0x15   :  { %p186_p9 = pnand %p185_p8, %p179_p5 }
  0x17   :  { %189 = shalt.err (!%p186_p9)
}
  0x18   :  { %s220_s19 = smov 64   ;;  %s221_s20 = smov 4  }
  0x19   :  { %33 = dma.hbm_to_vmem [thread:$0]  %s256_s1, 256, %s28_s17, [#allocation6], %s220_s19, %s220_s19, %s221_s20  }
  0x1a   :  { %210 = dma.done.wait [#allocation3], 256  }
  0x1b   :  { %211 = vsyncadd [#allocation3], 4294967040 }
  0x1c   :  { %212 = dma.done.wait [#allocation6], 256  }
  0x1d   :  { %213 = vsyncadd [#allocation6], 4294967040  ;;  %v222_v0 = vmov 0.0   ;;  %vm223_vm0 = vmmov 0   ;;  %v148_v1 = vld [vmem:[#allocation5 + $0x8] sm:$0xff]   ;;  %v149_v2 = vld [vmem:[#allocation5] sm:$0xff]  }
  0x1e   :  { %131 = vmatprep.subr.bf16.mxu0 %v222_v0  ;;  %135 = vmatprep.mubr.msk.bf16.mxu0 %vm223_vm0, %v222_v0  ;;  %v41_v3 = vld [vmem:[#allocation2] sm:$0xff]  ;;  %v42_v4 = vld [vmem:[#allocation2 + $0x8] sm:$0xff]  ;;  %vm60_vm1 = vcmask 261120   ;;  %s224_s0 = smov [#allocation7]  }
  0x1f   :  { %132 = vmatpush3.bf16.msra.mxu0 %v148_v1  ;;  %v43_v5 = vpack.c.bf16 %v42_v4, %v41_v3  ;;  %s112_s1 = sshll.u32 %s224_s0, 4  ;;  %s113_s1 = int_to_ptr.vmem [resolvable:$true] %s112_s1 }
  0x20   :  { %133 = vmatprep.subr.bf16.mxu0 %v222_v0  ;;  %s190_s23 = scalar_lea.vmem %s113_s1, 256  ;;  %p195_p11 = scmp.lt.s32.totalorder %s113_s1, %s113_s1 }
  0x21   :  { %p191_p10 = scmp.ne.s32.totalorder %s113_s1, %s190_s23  ;;  %p196_p12 = scmp.lt.s32.totalorder %s190_s23, %s190_s23 }
  0x23   :  { %134 = vmatpush3.bf16.msra.mxu0 %v149_v2  ;;  %p197_p13 = por %p196_p12, %p195_p11 }
  0x25   :  { %p198_p0 = pnand %p197_p13, %p191_p10 }
  0x26   :  { %136 = vmatmul.mubr.msk.bf16.vlgmr.msra.gmra.mxu0 %vm60_vm1, %v43_v5 }
  0xe6   :  { %v98_v6 = vpop.f32.mrf.mxu0 }
  0xe7   :  { %105 = vst [vmem:[#allocation7] sm:$0xff] %v98_v6 }
  0xe8   :  { %v137_v7 = vpop.f32.mrf.mxu0 }
  0xea   :  { %v101_v8 = vpop.f32.mrf.mxu0 }
  0xeb   :  { %106 = vst [vmem:[#allocation7 + $0x8] sm:$0xff] %v101_v8 }
  0xec   :  { %v138_v9 = vpop.f32.mrf.mxu0 }
  0xed   :  { %201 = shalt.err (!%p198_p0)
}
  0xee   :  { %118 = dma.vmem_to_hbm [thread:$0]  %s113_s1, 256, %s257_s2, [#allocation4], %s217_s12, %s217_s12, %s218_s13  }
  0xef   :  { %214 = dma.done.wait [#allocation4], 256  }
  0xf0   :  { %215 = vsyncadd [#allocation4], 4294967040 }
  0xf1   :  { %122 = vsyncpa [#allocation3], 1 }
  0xf2   :  { %123 = vsyncpa [#allocation6], 1 }
  0xf3   :  { %124 = vsyncpa [#allocation4], 1 }

</bundles_post_ra>
